<compile_context>
chip_gen: v5e
topology: v5e:2x2
jax: 0.10.0
libtpu: 0.0.40
codegen_flags: <defaults>
</compile_context>

<pallas_src>
import math

import jax
import jax.numpy as jnp
from jax.experimental import pallas as pl
from jax.experimental.pallas import tpu as pltpu


def _round_up(n: int, m: int) -> int:
    return ((n + m - 1) // m) * m


def baseline_mlp_kernel(x_ref, w1_ref, w2_ref, aux_ref, b3_ref, o_ref):
    """One batch tile of the Baseline MLP.

    x_ref   : (TB, D)   compute dtype (f32 or bf16)
    w1_ref  : (D, 64)   compute dtype
    w2_ref  : (64, 64)  compute dtype
    aux_ref : (3, 64)   f32 — rows: [b1, b2, w3_row]
    b3_ref  : (1,)      f32 scalar in SMEM
    o_ref   : (TB, 1)   f32
    """
    b1 = aux_ref[0:1, :]        # (1, 64) f32
    b2 = aux_ref[1:2, :]        # (1, 64) f32
    w3_row = aux_ref[2:3, :]    # (1, 64) f32

    # Layer 1: Linear(D, 64) + Tanh  (MXU matmul, f32 accumulation)
    h1 = jnp.dot(x_ref[...], w1_ref[...], preferred_element_type=jnp.float32)
    h1 = jnp.tanh(h1 + b1)                      # activations kept in f32

    # Layer 2: Linear(64, 64) + Tanh
    h2 = jnp.dot(h1.astype(w2_ref.dtype), w2_ref[...],
                 preferred_element_type=jnp.float32)
    h2 = jnp.tanh(h2 + b2)

    # Layer 3: Linear(64, 1) value head as a VPU multiply + lane reduce
    # (avoids an N=1 MXU matmul that wastes a full result push/pop).
    out = jnp.sum(h2 * w3_row, axis=-1, keepdims=True) + b3_ref[0]
    o_ref[...] = out.astype(o_ref.dtype)


def baseline_forward(x, params, *, compute_dtype=jnp.float32, batch_tile=1024):
    """Baseline MLP forward pass as a single batch-tiled Pallas kernel.

    params = (w1 (D,64), b1 (64,), w2 (64,64), b2 (64,), w3 (64,1), b3 (1,))
    """
    w1, b1, w2, b2, w3, b3 = params
    B, D = x.shape

    # Pack the tiny constants: one (3,64) f32 VMEM array + one SMEM scalar.
    aux = jnp.stack(
        [b1.astype(jnp.float32),
         b2.astype(jnp.float32),
         w3[:, 0].astype(jnp.float32)],   # (64,1) -> (64,) row, reshaped here (not in-kernel)
        axis=0)                            # (3, 64)
    b3s = b3.reshape((1,)).astype(jnp.float32)

    # Choose batch tile. Working set stays ~3 MiB even on v7x (64 MiB VMEM).
    if B <= batch_tile:
        TB = _round_up(max(B, 1), 8)       # sublane alignment
        B_pad = TB                          # single grid step
    else:
        TB = batch_tile                     # multiple of 8 (and 128)
        B_pad = _round_up(B, TB)
    if B_pad != B:
        x = jnp.pad(x, ((0, B_pad - B), (0, 0)))

    # Cast MXU operands ONCE in the wrapper (bf16 fast path on v6e/v7x).
    xc = x.astype(compute_dtype)
    w1c = w1.astype(compute_dtype)
    w2c = w2.astype(compute_dtype)

    grid = (B_pad // TB,)
    out = pl.pallas_call(
        baseline_mlp_kernel,
        out_shape=jax.ShapeDtypeStruct((B_pad, 1), jnp.float32),
        grid=grid,
        in_specs=[
            pl.BlockSpec((TB, D), lambda i: (i, 0)),             # x: streamed per tile
            pl.BlockSpec((D, 64), lambda i: (0, 0)),             # w1: resident
            pl.BlockSpec((64, 64), lambda i: (0, 0)),            # w2: resident
            pl.BlockSpec((3, 64), lambda i: (0, 0)),             # aux: resident
            pl.BlockSpec(memory_space=pltpu.MemorySpace.SMEM),   # b3 scalar
        ],
        out_specs=pl.BlockSpec((TB, 1), lambda i: (i, 0)),
        compiler_params=pltpu.CompilerParams(
            # Batch tiles are independent -> v7x can shard them over its 2 TCs.
            dimension_semantics=("parallel",),
        ),
    )(xc, w1c, w2c, aux, b3s)
    return out[:B]


def init_baseline_params(key, num_inputs):
    """Deterministic init mimicking PyTorch nn.Linear default U(-1/sqrt(fan_in), +)."""
    dims = [(num_inputs, 64), (64, 64), (64, 1)]
    params = []
    for fan_in, fan_out in dims:
        key, kw, kb = jax.random.split(key, 3)
        bound = 1.0 / math.sqrt(fan_in)
        # stored as (in, out) so the kernel computes x @ W  (== PyTorch x @ W.T + b)
        w = jax.random.uniform(kw, (fan_in, fan_out), jnp.float32, -bound, bound)
        b = jax.random.uniform(kb, (fan_out,), jnp.float32, -bound, bound)
        params.extend([w, b])
    return tuple(params)


if __name__ == "__main__":
    key = jax.random.PRNGKey(0)
    num_inputs = 32   # observation dimension
    batch = 8

    k_x, k_p = jax.random.split(key)
    x = jax.random.normal(k_x, (batch, num_inputs), dtype=jnp.float32)
    params = init_baseline_params(k_p, num_inputs)
    w1, b1, w2, b2, w3, b3 = params

    # Plain-JAX reference.
    ref = jnp.tanh(x @ w1 + b1)
    ref = jnp.tanh(ref @ w2 + b2)
    ref = ref @ w3 + b3

    # 1) f32 path (exact check).
    out = jax.block_until_ready(baseline_forward(x, params))
    assert out.shape == (batch, 1)
    assert jnp.allclose(out, ref, atol=1e-5), "f32 mismatch vs reference"

    # 2) bf16 MXU fast path (v6e/v7x), f32 accumulation — loose tolerance.
    out_bf16 = jax.block_until_ready(
        baseline_forward(x, params, compute_dtype=jnp.bfloat16))
    assert jnp.allclose(out_bf16, ref, atol=5e-2, rtol=5e-2), "bf16 mismatch vs reference"

    # 3) Multi-tile grid path with a non-aligned larger batch (exercises
    #    padding + batch pipeline + parallel grid axis).
    big_B = 2500
    xb = jax.random.normal(jax.random.PRNGKey(1), (big_B, num_inputs), jnp.float32)
    ref_big = jnp.tanh(xb @ w1 + b1)
    ref_big = jnp.tanh(ref_big @ w2 + b2)
    ref_big = ref_big @ w3 + b3
    out_big = jax.block_until_ready(
        baseline_forward(xb, params, batch_tile=1024))
    assert out_big.shape == (big_B, 1)
    assert jnp.allclose(out_big, ref_big, atol=1e-5), "tiled path mismatch vs reference"

    print("KERNEL_OK")
</pallas_src>

<mosaic_0001>
module attributes {stable_mosaic.version = 11 : i64} {
  func.func @baseline_mlp_kernel(%arg0: i32, %arg1: memref<8x32xf32, #tpu.memory_space<vmem>>, %arg2: memref<32x64xf32, #tpu.memory_space<vmem>>, %arg3: memref<64x64xf32, #tpu.memory_space<vmem>>, %arg4: memref<3x64xf32, #tpu.memory_space<vmem>>, %arg5: memref<1xf32, #tpu.memory_space<smem>>, %arg6: memref<8x1xf32, #tpu.memory_space<vmem>>) attributes {dimension_semantics = [#tpu.dimension_semantics<parallel>], iteration_bounds = array<i64: 1>, scalar_prefetch = 0 : i64, scratch_operands = 0 : i64, tpu.core_type = #tpu.core_type<tc>, window_params = [{transform_indices = @transform_0, window_bounds = array<i64: 8, 32>}, {pipeline_mode = #tpu.pipeline_mode<synchronous>, transform_indices = @transform_1, window_bounds = array<i64: 32, 64>}, {pipeline_mode = #tpu.pipeline_mode<synchronous>, transform_indices = @transform_2, window_bounds = array<i64: 64, 64>}, {pipeline_mode = #tpu.pipeline_mode<synchronous>, transform_indices = @transform_3, window_bounds = array<i64: 3, 64>}, {transform_indices = @transform_4, window_bounds = array<i64: 1>}, {transform_indices = @transform_5, window_bounds = array<i64: 8, 1>}]} {
    %c0 = arith.constant 0 : index
    %c0_0 = arith.constant 0 : index
    %0 = vector.load %arg4[%c0, %c0_0] : memref<3x64xf32, #tpu.memory_space<vmem>>, vector<1x64xf32>
    %c1 = arith.constant 1 : index
    %c0_1 = arith.constant 0 : index
    %1 = vector.load %arg4[%c1, %c0_1] : memref<3x64xf32, #tpu.memory_space<vmem>>, vector<1x64xf32>
    %c2 = arith.constant 2 : index
    %c0_2 = arith.constant 0 : index
    %2 = vector.load %arg4[%c2, %c0_2] : memref<3x64xf32, #tpu.memory_space<vmem>>, vector<1x64xf32>
    %c0_3 = arith.constant 0 : index
    %c0_4 = arith.constant 0 : index
    %3 = vector.load %arg1[%c0_3, %c0_4] : memref<8x32xf32, #tpu.memory_space<vmem>>, vector<8x32xf32>
    %c0_5 = arith.constant 0 : index
    %c0_6 = arith.constant 0 : index
    %4 = vector.load %arg2[%c0_5, %c0_6] : memref<32x64xf32, #tpu.memory_space<vmem>>, vector<32x64xf32>
    %cst = arith.constant dense<0.000000e+00> : vector<8x64xf32>
    %5 = tpu.matmul %3, %4, %cst {dimension_numbers = #tpu.dot_dimension_numbers<[1], [0], [0], [1], [0, 0, 1, 1], [], []>} : vector<8x32xf32>, vector<32x64xf32>, vector<8x64xf32> -> vector<8x64xf32>
    %6 = vector.broadcast %0 : vector<1x64xf32> to vector<8x64xf32>
    %7 = arith.addf %5, %6 : vector<8x64xf32>
    %8 = math.tanh %7 : vector<8x64xf32>
    %c0_7 = arith.constant 0 : index
    %c0_8 = arith.constant 0 : index
    %9 = vector.load %arg3[%c0_7, %c0_8] : memref<64x64xf32, #tpu.memory_space<vmem>>, vector<64x64xf32>
    %cst_9 = arith.constant dense<0.000000e+00> : vector<8x64xf32>
    %10 = tpu.matmul %8, %9, %cst_9 {dimension_numbers = #tpu.dot_dimension_numbers<[1], [0], [0], [1], [0, 0, 1, 1], [], []>} : vector<8x64xf32>, vector<64x64xf32>, vector<8x64xf32> -> vector<8x64xf32>
    %11 = vector.broadcast %1 : vector<1x64xf32> to vector<8x64xf32>
    %12 = arith.addf %10, %11 : vector<8x64xf32>
    %13 = math.tanh %12 : vector<8x64xf32>
    %14 = vector.broadcast %2 : vector<1x64xf32> to vector<8x64xf32>
    %15 = arith.mulf %13, %14 : vector<8x64xf32>
    %cst_10 = arith.constant dense<0.000000e+00> : vector<8xf32>
    %16 = vector.multi_reduction <add>, %15, %cst_10 [1] : vector<8x64xf32> to vector<8xf32>
    %17 = vector.shape_cast %16 : vector<8xf32> to vector<8x1xf32>
    %c0_11 = arith.constant 0 : index
    %18 = memref.load %arg5[%c0_11] : memref<1xf32, #tpu.memory_space<smem>>
    %19 = vector.broadcast %18 : f32 to vector<8x1xf32>
    %20 = arith.addf %17, %19 : vector<8x1xf32>
    %c0_12 = arith.constant 0 : index
    %c0_13 = arith.constant 0 : index
    %21 = vector.load %arg6[%c0_12, %c0_13] : memref<8x1xf32, #tpu.memory_space<vmem>>, vector<8x1xf32>
    tpu.vector_store %arg6[%c0_12, %c0_13], %20 {strides = array<i32>} : memref<8x1xf32, #tpu.memory_space<vmem>>, vector<8x1xf32>,
    return
  }
  func.func @transform_0(%arg0: i32) -> (i32, i32) {
    %c0_i32 = arith.constant 0 : i32
    %c0_i32_0 = arith.constant 0 : i32
    return %arg0, %c0_i32 : i32, i32
  }
  func.func @transform_1(%arg0: i32) -> (i32, i32) {
    %c0_i32 = arith.constant 0 : i32
    %c0_i32_0 = arith.constant 0 : i32
    %c0_i32_1 = arith.constant 0 : i32
    return %c0_i32, %c0_i32_0 : i32, i32
  }
  func.func @transform_2(%arg0: i32) -> (i32, i32) {
    %c0_i32 = arith.constant 0 : i32
    %c0_i32_0 = arith.constant 0 : i32
    %c0_i32_1 = arith.constant 0 : i32
    return %c0_i32, %c0_i32_0 : i32, i32
  }
  func.func @transform_3(%arg0: i32) -> (i32, i32) {
    %c0_i32 = arith.constant 0 : i32
    %c0_i32_0 = arith.constant 0 : i32
    %c0_i32_1 = arith.constant 0 : i32
    return %c0_i32, %c0_i32_0 : i32, i32
  }
  func.func @transform_4(%arg0: i32) -> i32 {
    %c0_i32 = arith.constant 0 : i32
    %c0_i32_0 = arith.constant 0 : i32
    return %c0_i32 : i32
  }
  func.func @transform_5(%arg0: i32) -> (i32, i32) {
    %c0_i32 = arith.constant 0 : i32
    %c0_i32_0 = arith.constant 0 : i32
    return %arg0, %c0_i32 : i32, i32
  }
}

</mosaic_0001>

<bundles_post_ra>
// kernel: tpu_custom_call.1
= control target key start
LH: loop header
LB: loop body
LE: loop exit
PB: predicated region body
PF: predicated region fallthrough
CT: control target
= control target key end

     0   :  { %11 = vsyncpa [#allocation4], 0  ;;  %s299_s0 = inlined_call_operand.hbm [shape: f32[8,32], index: 0, kind: input, shape index: {}]   ;;  %s300_s1 = inlined_call_operand.hbm [shape: f32[32,64], index: 1, kind: input, shape index: {}]   ;;  %s301_s2 = inlined_call_operand.hbm [shape: f32[64,64], index: 2, kind: input, shape index: {}]   ;;  %s302_s3 = inlined_call_operand.vmem [shape: f32[3,64], index: 3, kind: input, shape index: {}]   ;;  %s303_s4 = inlined_call_operand.<no memory space> [shape: f32[1], index: 4, kind: input, shape index: {}]   ;;  %s304_s5 = inlined_call_operand.vmem [shape: f32[8,1], index: 5, kind: output, shape index: {}]  }
   0x1   :  { %12 = vsyncpa [#allocation6], 0  ;;  %s28_s20 = sshll.u32 %s300_s1, 4  ;;  %s240_s21 = smov [#allocation5]   ;;  %s29_s20 = int_to_ptr.hbm [resolvable:$true] %s28_s20 }
   0x2   :  { %s30_s22 = sshll.u32 %s240_s21, 4  ;;  %s18_s25 = sshll.u32 %s299_s0, 4  ;;  %s31_s22 = int_to_ptr.vmem [resolvable:$true] %s30_s22  ;;  %s19_s25 = int_to_ptr.hbm [resolvable:$true] %s18_s25 }
   0x3   :  { %s241_s26 = smov 128   ;;  %s242_s27 = smov 8  }
   0x4   :  { %36 = dma.hbm_to_vmem [thread:$0]  %s29_s20, 512, %s31_s22, [#allocation6], %s241_s26, %s241_s26, %s242_s27  }
   0x5   :  { %s243_s28 = smov [#allocation3]   ;;  %s41_s7 = sshll.u32 %s301_s2, 4  ;;  %s42_s7 = int_to_ptr.hbm [resolvable:$true] %s41_s7 }
   0x6   :  { %s20_s29 = sshll.u32 %s243_s28, 4  ;;  %s244_s1 = smov [#allocation7]   ;;  %s21_s29 = int_to_ptr.vmem [resolvable:$true] %s20_s29 }
   0x7   :  { %23 = dma.hbm_to_vmem [thread:$0]  %s19_s25, 128, %s21_s29, [#allocation4]  }
   0x8   :  { %s43_s8 = sshll.u32 %s244_s1, 4  ;;  %s44_s8 = int_to_ptr.vmem [resolvable:$true] %s43_s8 }
   0x9   :  { %49 = dma.hbm_to_vmem [thread:$0]  %s42_s7, 1024, %s44_s8, [#allocation6], %s241_s26, %s241_s26, %s242_s27  }
   0xa   :  { %236 = dma.done.wait [#allocation4], 128  }
   0xb   :  { %237 = vsyncadd [#allocation4], 4294967168 }
   0xc   :  { %238 = dma.done.wait [#allocation6], 1536  }
   0xd   :  { %239 = vsyncadd [#allocation6], 4294965760  ;;  %v73_v0 = vld [vmem:[#allocation5 + $0x18] sm:$0xff]  ;;  %v72_v1 = vld [vmem:[#allocation5 + $0x10] sm:$0xff]  ;;  %vm75_vm0 = vcmask 261120   ;;  %vm109_vm1 = vcmask 523264   ;;  %v140_v24 = vstv %s303_s4 }
   0xe   :  { %91 = vmatpush.msra.mxu0 %v73_v0  ;;  %v107_v2 = vld [vmem:[#allocation7 + $0x38] sm:$0xff]  ;;  %v71_v3 = vld [vmem:[#allocation5 + $0x8] sm:$0xff]  ;;  %v106_v4 = vld [vmem:[#allocation7 + $0x30] sm:$0xff]  ;;  %vm142_vm2 = vcmask 7168  }
   0xf   :  { %121 = vmatpush.msra.mxu1 %v107_v2  ;;  %v105_v5 = vld [vmem:[#allocation7 + $0x28] sm:$0xff]  ;;  %v70_v6 = vld [vmem:[#allocation5] sm:$0xff]  ;;  %v69_v7 = vld [vmem:[#allocation3] sm:$0xff] }
  0x10   :  { %92 = vmatpush.msra.mxu0 %v72_v1  ;;  %v104_v8 = vld [vmem:[#allocation7 + $0x20] sm:$0xff]  ;;  %v103_v9 = vld [vmem:[#allocation7 + $0x18] sm:$0xff]  ;;  %v102_v10 = vld [vmem:[#allocation7 + $0x10] sm:$0xff] }
  0x11   :  { %122 = vmatpush.msra.mxu1 %v106_v4  ;;  %v101_v11 = vld [vmem:[#allocation7 + $0x8] sm:$0xff]  ;;  %v100_v12 = vld [vmem:[#allocation7] sm:$0xff]  ;;  %v157_v13 = vld [vmem:[%s302_s3] ss:$0 sm:$0xff] }
  0x12   :  { %93 = vmatpush.msra.mxu0 %v71_v3  ;;  %v158_v17 = vld [vmem:[%s302_s3 + $0x1] ss:$0 sm:$0xff]  ;;  %v159_v20 = vld [vmem:[%s302_s3 + $0x2] ss:$0 sm:$0xff] }
  0x13   :  { %123 = vmatpush.msra.mxu1 %v105_v5 }
  0x14   :  { %94 = vmatpush.msra.mxu0 %v70_v6 }
  0x15   :  { %150 = vmatmul.msk.f32.vlgmr.msra.gmra.mxu0 %vm75_vm0, %v69_v7  ;;  %124 = vmatpush.msra.mxu1 %v104_v8 }
  0x17   :  { %125 = vmatpush.msra.mxu1 %v103_v9 }
  0x19   :  { %126 = vmatpush.msra.mxu1 %v102_v10 }
  0x1b   :  { %127 = vmatpush.msra.mxu1 %v101_v11 }
  0x1d   :  { %128 = vmatpush.msra.mxu1 %v100_v12 }
  0x92   :  { %v96_v14 = vpop.f32.mrf.mxu0 }
  0x93   :  { %v97_v15 = vadd.f32 %v157_v13, %v96_v14 }
  0x95   :  { %160 = vtanh.f32 %v97_v15 }
  0x9b   :  { %v161_v16 = vpop.eup %160 }
  0x9c   :  { %151 = vmatmul.msk.f32.vlgmr.msra.gmra.mxu1 %vm109_vm1, %v161_v16 }
 0x119   :  { %v130_v18 = vpop.f32.mrf.mxu1 }
 0x11a   :  { %v131_v19 = vadd.f32 %v158_v17, %v130_v18 }
 0x11c   :  { %162 = vtanh.f32 %v131_v19 }
 0x122   :  { %v163_v21 = vpop.eup %162 }
 0x123   :  { %v135_v22 = vmul.f32 %v163_v21, %v159_v20 }
 0x125   :  { %v136_v23 = vsel %vm109_vm1, %v135_v22, 0.0 }
 0x126   :  { %137 = vadd.xlane.f32.xlu0 %v136_v23 }
 0x199   :  { %v138_v25 = vpop.xlane.xlu0 %137 }
 0x19a   :  { %v141_v26 = vadd.f32 %v140_v24, %v138_v25 }
 0x19c   :  { %143 = vst.msk [vmem:[%s304_s5] sm:$0xff] %vm142_vm2, %v141_v26 }
 0x19d   :  { %148 = vsyncpa [#allocation4], 1 }
 0x19e   :  { %149 = vsyncpa [#allocation6], 1 }

</bundles_post_ra>
